<compile_context>
chip_gen: v5e
topology: v5e:2x2
jax: 0.10.0
libtpu: 0.0.40
codegen_flags: <defaults>
</compile_context>

<pallas_src>
import math
from functools import partial

import numpy as np
import jax
import jax.numpy as jnp
from jax.experimental import pallas as pl
from jax.experimental.pallas import tpu as pltpu

# ----------------------------- synthetic config -----------------------------
IN_FEATS_DIM = 1          # config.in_feats_dim
ENC_OUT = 64              # encoder_skip_dims[-1] * 2  (input dim of feat_proj)
D_EMBED = 48              # config.d_embed  (divisible by 3 and by nhead)
NHEAD = 4                 # config.nhead
D_HEAD = D_EMBED // NHEAD
D_FF = 64                 # config.d_feedforward
NUM_LAYERS = 2            # config.num_encoder_layers
POS_EMB_SCALE = 1.0       # config.pos_emb_scaling
FINE_DIMS = [D_EMBED + 2, 64, 64, 32, 32, 16, 16, 8, 3]   # self.fine MLP
MAXN = 12000
RATIO = 1.0
LN_EPS = 1e-5
NEG_INF = -1e30
OUT_PAD = 128             # lane-dense padded width for narrow final outputs


def _round_up(x, m):
    return ((x + m - 1) // m) * m


def _row_tile(n, max_tm=512):
    """Pick a row-tile size and padded row count (tile divides padded rows)."""
    n_pad = _round_up(max(n, 1), 8)
    tm = min(max_tm, n_pad)
    n_pad = _round_up(n_pad, tm)
    return tm, n_pad


def _pad_rows(x, n_pad):
    n = x.shape[0]
    if n == n_pad:
        return x
    return jnp.pad(x, ((0, n_pad - n), (0, 0)))


# ----------------------------- in-kernel helpers -----------------------------
def _dot(a, b):
    """MXU matmul, bf16 inputs / f32 accumulation."""
    return jnp.dot(a.astype(jnp.bfloat16), b.astype(jnp.bfloat16),
                   preferred_element_type=jnp.float32)


def _dot_t(a, b):
    """a @ b.T (contract last dims), bf16 inputs / f32 accumulation."""
    return jax.lax.dot_general(
        a.astype(jnp.bfloat16), b.astype(jnp.bfloat16),
        (((1,), (1,)), ((), ())), preferred_element_type=jnp.float32)


def _layernorm(x, g, b, eps=LN_EPS):
    mu = jnp.mean(x, axis=-1, keepdims=True)
    xc = x - mu
    var = jnp.mean(xc * xc, axis=-1, keepdims=True)
    return xc * jax.lax.rsqrt(var + eps) * g + b


# ----------------------------- Pallas kernels --------------------------------
def _enc_proj_kernel(f_ref, ew_ref, eb_ref, pw_ref, pb_ref, o_ref):
    # encoder stand-in Linear+ReLU fused with feat_proj Linear
    h = jnp.maximum(_dot(f_ref[...], ew_ref[...]) + eb_ref[...], 0.0)
    o_ref[...] = (_dot(h, pw_ref[...]) + pb_ref[...]).astype(o_ref.dtype)


def _qkv_kernel(src_ref, pe_ref, w_ref, b_ref, o_ref):
    # fused QKV projection of (src + pos_emb); q = k = v-input (sa_val_has_pos_emb)
    x = src_ref[...] + pe_ref[...]
    o_ref[...] = (_dot(x, w_ref[...]) + b_ref[...]).astype(o_ref.dtype)


def _attn_tail_kernel(src_ref, qkv_row_ref, qkv_all_ref,
                      wo_ref, bo_ref, g1_ref, bn1_ref,
                      w1_ref, b1_ref, w2_ref, b2_ref, g2_ref, bn2_ref,
                      o_ref, *, n_valid, n_pad, kv_tile, scale):
    """All heads of self-attention (KV-chunked online softmax) + out-proj +
    residual + LN1 + FFN + residual + LN2, for one row tile of queries."""
    D, H, dh = D_EMBED, NHEAD, D_HEAD
    tm = src_ref.shape[0]
    n_chunks = n_pad // kv_tile

    q = qkv_row_ref[:, pl.ds(0, D)]                      # (tm, D)
    m = [jnp.full((tm, 1), NEG_INF, jnp.float32) for _ in range(H)]
    l = [jnp.zeros((tm, 1), jnp.float32) for _ in range(H)]
    acc = [jnp.zeros((tm, dh), jnp.float32) for _ in range(H)]

    for c in range(n_chunks):                            # static trip count
        r0 = c * kv_tile
        kc = qkv_all_ref[pl.ds(r0, kv_tile), pl.ds(D, D)]        # (kv, D)
        vc = qkv_all_ref[pl.ds(r0, kv_tile), pl.ds(2 * D, D)]    # (kv, D)
        for h in range(H):
            qh = q[:, h * dh:(h + 1) * dh]
            kh = kc[:, h * dh:(h + 1) * dh]
            vh = vc[:, h * dh:(h + 1) * dh]
            s = _dot_t(qh, kh) * scale                   # (tm, kv)
            if n_valid < n_pad:                          # mask padded keys
                col = jax.lax.broadcasted_iota(jnp.int32, (tm, kv_tile), 1) + r0
                s = jnp.where(col >= n_valid, NEG_INF, s)
            m_new = jnp.maximum(m[h], jnp.max(s, axis=-1, keepdims=True))
            alpha = jnp.exp(m[h] - m_new)
            p = jnp.exp(s - m_new)
            l[h] = alpha * l[h] + jnp.sum(p, axis=-1, keepdims=True)
            acc[h] = alpha * acc[h] + _dot(p, vh)
            m[h] = m_new

    heads = [acc[h] * pl.reciprocal(l[h], approx=True) for h in range(H)]
    attn = jnp.concatenate(heads, axis=-1)               # (tm, D)

    x = src_ref[...] + _dot(attn, wo_ref[...]) + bo_ref[...]
    x = _layernorm(x, g1_ref[...], bn1_ref[...])
    ff = jnp.maximum(_dot(x, w1_ref[...]) + b1_ref[...], 0.0)
    x = x + _dot(ff, w2_ref[...]) + b2_ref[...]
    x = _layernorm(x, g2_ref[...], bn2_ref[...])
    o_ref[...] = x.astype(o_ref.dtype)


def _classify_kernel(x_ref, w1_ref, b1_ref, w2_ref, b2_ref, o_ref):
    # Linear -> ReLU -> Linear -> Sigmoid, lane-dense padded output
    h = jnp.maximum(_dot(x_ref[...], w1_ref[...]) + b1_ref[...], 0.0)
    s = jax.nn.sigmoid(_dot(h, w2_ref[...]) + b2_ref[...])          # (tm, 1)
    o_ref[...] = jnp.broadcast_to(s, (s.shape[0], OUT_PAD)).astype(o_ref.dtype)


def _fine_mlp_kernel(x_ref, *refs):
    # refs = (w1, b1, ..., w8, b8, o_ref); ReLU between all layers, none after last
    o_ref = refs[-1]
    wb = refs[:-1]
    n_layers = len(wb) // 2
    h = x_ref[...]
    for li in range(n_layers):
        h = _dot(h, wb[2 * li][...]) + wb[2 * li + 1][...]
        if li < n_layers - 1:
            h = jnp.maximum(h, 0.0)
    pad = jnp.zeros((h.shape[0], OUT_PAD - h.shape[1]), h.dtype)
    o_ref[...] = jnp.concatenate([h, pad], axis=-1).astype(o_ref.dtype)


# ----------------------------- kernel wrappers --------------------------------
_PAR = pltpu.CompilerParams(dimension_semantics=("parallel",))


def enc_proj(feats_p, params, tm):
    n_pad, cin = feats_p.shape
    return pl.pallas_call(
        _enc_proj_kernel,
        out_shape=jax.ShapeDtypeStruct((n_pad, D_EMBED), jnp.float32),
        grid=(n_pad // tm,),
        in_specs=[
            pl.BlockSpec((tm, cin), lambda i: (i, 0)),
            pl.BlockSpec((cin, ENC_OUT), lambda i: (0, 0)),
            pl.BlockSpec((1, ENC_OUT), lambda i: (0, 0)),
            pl.BlockSpec((ENC_OUT, D_EMBED), lambda i: (0, 0)),
            pl.BlockSpec((1, D_EMBED), lambda i: (0, 0)),
        ],
        out_specs=pl.BlockSpec((tm, D_EMBED), lambda i: (i, 0)),
        compiler_params=_PAR,
    )(feats_p, params["enc_w"], params["enc_b"].reshape(1, -1),
      params["proj_w"], params["proj_b"].reshape(1, -1))


def transformer_layer(src_p, pe_p, lp, tm, kv_tile, n_valid):
    n_pad = src_p.shape[0]

    qkv = pl.pallas_call(
        _qkv_kernel,
        out_shape=jax.ShapeDtypeStruct((n_pad, 3 * D_EMBED), jnp.float32),
        grid=(n_pad // tm,),
        in_specs=[
            pl.BlockSpec((tm, D_EMBED), lambda i: (i, 0)),
            pl.BlockSpec((tm, D_EMBED), lambda i: (i, 0)),
            pl.BlockSpec((D_EMBED, 3 * D_EMBED), lambda i: (0, 0)),
            pl.BlockSpec((1, 3 * D_EMBED), lambda i: (0, 0)),
        ],
        out_specs=pl.BlockSpec((tm, 3 * D_EMBED), lambda i: (i, 0)),
        compiler_params=_PAR,
    )(src_p, pe_p, lp["wqkv"], lp["bqkv"].reshape(1, -1))

    out = pl.pallas_call(
        partial(_attn_tail_kernel, n_valid=n_valid, n_pad=n_pad,
                kv_tile=kv_tile, scale=1.0 / math.sqrt(D_HEAD)),
        out_shape=jax.ShapeDtypeStruct((n_pad, D_EMBED), jnp.float32),
        grid=(n_pad // tm,),
        in_specs=[
            pl.BlockSpec((tm, D_EMBED), lambda i: (i, 0)),          # src (residual)
            pl.BlockSpec((tm, 3 * D_EMBED), lambda i: (i, 0)),      # qkv row tile (Q)
            pl.BlockSpec((n_pad, 3 * D_EMBED), lambda i: (0, 0)),   # qkv full (K, V)
            pl.BlockSpec((D_EMBED, D_EMBED), lambda i: (0, 0)),     # wo
            pl.BlockSpec((1, D_EMBED), lambda i: (0, 0)),           # bo
            pl.BlockSpec((1, D_EMBED), lambda i: (0, 0)),           # ln1_g
            pl.BlockSpec((1, D_EMBED), lambda i: (0, 0)),           # ln1_b
            pl.BlockSpec((D_EMBED, D_FF), lambda i: (0, 0)),        # w1
            pl.BlockSpec((1, D_FF), lambda i: (0, 0)),              # b1
            pl.BlockSpec((D_FF, D_EMBED), lambda i: (0, 0)),        # w2
            pl.BlockSpec((1, D_EMBED), lambda i: (0, 0)),           # b2
            pl.BlockSpec((1, D_EMBED), lambda i: (0, 0)),           # ln2_g
            pl.BlockSpec((1, D_EMBED), lambda i: (0, 0)),           # ln2_b
        ],
        out_specs=pl.BlockSpec((tm, D_EMBED), lambda i: (i, 0)),
        compiler_params=_PAR,
    )(src_p, qkv, qkv,
      lp["wo"], lp["bo"].reshape(1, -1),
      lp["ln1_g"].reshape(1, -1), lp["ln1_b"].reshape(1, -1),
      lp["w1"], lp["b1"].reshape(1, -1),
      lp["w2"], lp["b2"].reshape(1, -1),
      lp["ln2_g"].reshape(1, -1), lp["ln2_b"].reshape(1, -1))
    return out


def classify(feats_p, params, tm):
    n_pad = feats_p.shape[0]
    out = pl.pallas_call(
        _classify_kernel,
        out_shape=jax.ShapeDtypeStruct((n_pad, OUT_PAD), jnp.float32),
        grid=(n_pad // tm,),
        in_specs=[
            pl.BlockSpec((tm, D_EMBED), lambda i: (i, 0)),
            pl.BlockSpec((D_EMBED, D_EMBED), lambda i: (0, 0)),
            pl.BlockSpec((1, D_EMBED), lambda i: (0, 0)),
            pl.BlockSpec((D_EMBED, 1), lambda i: (0, 0)),
            pl.BlockSpec((1, 1), lambda i: (0, 0)),
        ],
        out_specs=pl.BlockSpec((tm, OUT_PAD), lambda i: (i, 0)),
        compiler_params=_PAR,
    )(feats_p, params["cls_w1"], params["cls_b1"].reshape(1, -1),
      params["cls_w2"], params["cls_b2"].reshape(1, -1))
    return out[:, :1]


def pallas_fine_mlp(x, fine_params):
    """Fused 8-layer MLP (d_embed+2 -> ... -> 3) in a single Pallas kernel."""
    M, cin = x.shape
    tm, mp = _row_tile(M, max_tm=1024)
    xp = _pad_rows(x, mp)
    args = [xp]
    in_specs = [pl.BlockSpec((tm, cin), lambda i: (i, 0))]
    for (w, b) in fine_params:
        ci, co = w.shape
        args += [w, b.reshape(1, co)]
        in_specs += [pl.BlockSpec((ci, co), lambda i: (0, 0)),
                     pl.BlockSpec((1, co), lambda i: (0, 0))]
    out = pl.pallas_call(
        _fine_mlp_kernel,
        out_shape=jax.ShapeDtypeStruct((mp, OUT_PAD), jnp.float32),
        grid=(mp // tm,),
        in_specs=in_specs,
        out_specs=pl.BlockSpec((tm, OUT_PAD), lambda i: (i, 0)),
        compiler_params=_PAR,
    )(*args)
    return out[:M, :FINE_DIMS[-1]]


# ----------------------------- plain-JAX glue --------------------------------
def pos_embedding_sine(xyz, d_model, scale):
    """PositionEmbeddingCoordsSine(3, d_model, scale): sinusoidal embedding of xyz."""
    n_dim = xyz.shape[-1]
    num_pos_feats = d_model // n_dim // 2 * 2
    padding = d_model - num_pos_feats * n_dim
    x = xyz * (scale * 2.0 * math.pi)
    dim_t = jnp.arange(num_pos_feats, dtype=jnp.float32)
    dim_t = 10000.0 ** (2.0 * jnp.floor(dim_t / 2.0) / num_pos_feats)
    pos = x[..., None] / dim_t                      # (N, 3, num_pos_feats)
    pos_sin = jnp.sin(pos[..., 0::2])
    pos_cos = jnp.cos(pos[..., 1::2])
    pe = jnp.stack([pos_sin, pos_cos], axis=-1).reshape(xyz.shape[0], -1)
    if padding > 0:
        pe = jnp.pad(pe, ((0, 0), (0, padding)))
    return pe


def halton2(count):
    # TODO(synk): ghalton.GeneralizedHalton uses scrambling permutations; plain
    # (unscrambled) Halton in bases 2/3 is used here as the deterministic stand-in.
    def vdc(i, base):
        f, r = 1.0, 0.0
        while i > 0:
            f /= base
            r += f * (i % base)
            i //= base
        return r
    return np.array([[vdc(i + 1, 2), vdc(i + 1, 3)] for i in range(count)],
                    dtype=np.float32).reshape(count, 2)


# ----------------------------- model forward ---------------------------------
def ggnet_forward(params, batch):
    feats = batch["features"]
    pts = batch["points"][-1]
    n = pts.shape[0]
    tm, n_pad = _row_tile(n, max_tm=512)
    kv_tile = min(512, n_pad)

    # pad once at entry; all kernels carry the padded row count
    feats_p = _pad_rows(feats, n_pad)
    pts_p = _pad_rows(pts, n_pad)

    # TODO(synk): the KPConv encoder blocks (block_decider) need precomputed
    # neighbor/pooling indices and the full KPConv stack; replaced by a single
    # deterministic per-point projection fused with feat_proj in one kernel.
    src = enc_proj(feats_p, params, tm)                           # (Np, d_embed)
    pe = pos_embedding_sine(pts_p, D_EMBED, POS_EMB_SCALE)        # (Np, d_embed)

    # transformer_encoder(src=tgt=feats, pos=pe); post-norm, dropout=0
    for lp in params["layers"]:
        src = transformer_layer(src, pe, lp, tm, kv_tile, n_valid=n)

    score = classify(src, params, tm)                             # (Np, 1)
    return score[:n], src[:n]


def ggcfnet_forward(params, batch, n=None, maxn=MAXN, ratio=RATIO):
    score_pred, feats = ggnet_forward(params, batch)
    pts = batch["points"][-1]

    # TODO(synk): boolean selection / n_per_feat are inherently data-dependent
    # (host sync + per-bucket recompile of the fine MLP); a fully on-device
    # variant would need a fixed maxn-padded gather with scalar-prefetch indices.
    sel = np.asarray(score_pred).reshape(-1) > 0.5
    base_pts = np.asarray(pts)[sel]
    base_feats = np.asarray(feats)[sel]

    if n is None:
        n = int(np.asarray(batch["ground_mask"][0]).astype(np.int32).sum())
        n = min(n, maxn)
    n_per_feat = n // max(base_pts.shape[0], 1)

    total = base_pts.shape[0] * n_per_feat
    b_rnd = halton2(total)
    b_rnd = (b_rnd * ratio - ratio / 2.0) * 2.0

    feat_num, feat_dim = base_feats.shape
    rep_feats = np.repeat(base_feats, n_per_feat, axis=0).reshape(-1, feat_dim)
    mlp_in = jnp.concatenate([jnp.asarray(rep_feats), jnp.asarray(b_rnd)], axis=1)
    offsets = pallas_fine_mlp(mlp_in, params["fine"])

    rep_pts = jnp.asarray(np.repeat(base_pts, n_per_feat, axis=0).reshape(-1, 3))
    ground_generation = rep_pts + offsets
    return ground_generation, score_pred


# ----------------------------- parameter init --------------------------------
def init_params(key):
    keys = iter(jax.random.split(key, 128))

    def lin(cin, cout, scale=0.05):
        w = jax.random.normal(next(keys), (cin, cout), jnp.float32) * scale
        b = jnp.zeros((cout,), jnp.float32)
        return w, b

    params = {}
    params["enc_w"], params["enc_b"] = lin(IN_FEATS_DIM, ENC_OUT)
    params["proj_w"], params["proj_b"] = lin(ENC_OUT, D_EMBED)
    layers = []
    for _ in range(NUM_LAYERS):
        p = {}
        wq, bq = lin(D_EMBED, D_EMBED)
        wk, bk = lin(D_EMBED, D_EMBED)
        wv, bv = lin(D_EMBED, D_EMBED)
        p["wqkv"] = jnp.concatenate([wq, wk, wv], axis=1)     # (48, 144)
        p["bqkv"] = jnp.concatenate([bq, bk, bv], axis=0)     # (144,)
        p["wo"], p["bo"] = lin(D_EMBED, D_EMBED)
        p["w1"], p["b1"] = lin(D_EMBED, D_FF)
        p["w2"], p["b2"] = lin(D_FF, D_EMBED)
        p["ln1_g"] = jnp.ones((D_EMBED,), jnp.float32)
        p["ln1_b"] = jnp.zeros((D_EMBED,), jnp.float32)
        p["ln2_g"] = jnp.ones((D_EMBED,), jnp.float32)
        p["ln2_b"] = jnp.zeros((D_EMBED,), jnp.float32)
        layers.append(p)
    params["layers"] = layers
    params["cls_w1"], params["cls_b1"] = lin(D_EMBED, D_EMBED)
    params["cls_w2"], params["cls_b2"] = lin(D_EMBED, 1, scale=0.2)
    params["fine"] = [lin(ci, co, scale=0.1)
                      for ci, co in zip(FINE_DIMS[:-1], FINE_DIMS[1:])]
    return params


# ----------------------------------- main -------------------------------------
if __name__ == "__main__":
    N = 64  # number of points at the final (coarse) resolution
    key = jax.random.PRNGKey(0)
    k1, k2, k3 = jax.random.split(key, 3)

    pts = jax.random.uniform(k1, (N, 3), jnp.float32) * 2.0 - 1.0
    features = jnp.ones((N, IN_FEATS_DIM), jnp.float32)
    ground_mask = (jax.random.uniform(k2, (N,)) > 0.25).astype(jnp.float32)

    batch = {
        "features": features,
        "points": [pts, pts],          # [full-res, ..., coarse-res]; same here
        "ground_mask": [ground_mask],
    }

    params = init_params(k3)
    ground_generation, score_pred = ggcfnet_forward(params, batch)
    jax.block_until_ready((ground_generation, score_pred))

    assert score_pred.shape == (N, 1)
    assert ground_generation.shape[-1] == 3
    print("KERNEL_OK")
</pallas_src>

<mosaic_0001>
module attributes {stable_mosaic.version = 11 : i64} {
  func.func @_enc_proj_kernel(%arg0: i32, %arg1: memref<64x1xf32, #tpu.memory_space<vmem>>, %arg2: memref<1x64xf32, #tpu.memory_space<vmem>>, %arg3: memref<1x64xf32, #tpu.memory_space<vmem>>, %arg4: memref<64x48xf32, #tpu.memory_space<vmem>>, %arg5: memref<1x48xf32, #tpu.memory_space<vmem>>, %arg6: memref<64x48xf32, #tpu.memory_space<vmem>>) attributes {dimension_semantics = [#tpu.dimension_semantics<parallel>], iteration_bounds = array<i64: 1>, scalar_prefetch = 0 : i64, scratch_operands = 0 : i64, tpu.core_type = #tpu.core_type<tc>, window_params = [{transform_indices = @transform_0, window_bounds = array<i64: 64, 1>}, {pipeline_mode = #tpu.pipeline_mode<synchronous>, transform_indices = @transform_1, window_bounds = array<i64: 1, 64>}, {pipeline_mode = #tpu.pipeline_mode<synchronous>, transform_indices = @transform_2, window_bounds = array<i64: 1, 64>}, {pipeline_mode = #tpu.pipeline_mode<synchronous>, transform_indices = @transform_3, window_bounds = array<i64: 64, 48>}, {pipeline_mode = #tpu.pipeline_mode<synchronous>, transform_indices = @transform_4, window_bounds = array<i64: 1, 48>}, {transform_indices = @transform_5, window_bounds = array<i64: 64, 48>}]} {
    %c0 = arith.constant 0 : index
    %c0_0 = arith.constant 0 : index
    %0 = vector.load %arg1[%c0, %c0_0] : memref<64x1xf32, #tpu.memory_space<vmem>>, vector<64x1xf32>
    %c0_1 = arith.constant 0 : index
    %c0_2 = arith.constant 0 : index
    %1 = vector.load %arg2[%c0_1, %c0_2] : memref<1x64xf32, #tpu.memory_space<vmem>>, vector<1x64xf32>
    %2 = arith.truncf %0 : vector<64x1xf32> to vector<64x1xbf16>
    %3 = arith.truncf %1 : vector<1x64xf32> to vector<1x64xbf16>
    %cst = arith.constant dense<0.000000e+00> : vector<64x64xf32>
    %4 = tpu.matmul %2, %3, %cst {dimension_numbers = #tpu.dot_dimension_numbers<[1], [0], [0], [1], [0, 0, 1, 1], [], []>} : vector<64x1xbf16>, vector<1x64xbf16>, vector<64x64xf32> -> vector<64x64xf32>
    %c0_3 = arith.constant 0 : index
    %c0_4 = arith.constant 0 : index
    %5 = vector.load %arg3[%c0_3, %c0_4] : memref<1x64xf32, #tpu.memory_space<vmem>>, vector<1x64xf32>
    %6 = vector.broadcast %5 : vector<1x64xf32> to vector<64x64xf32>
    %7 = arith.addf %4, %6 : vector<64x64xf32>
    %cst_5 = arith.constant 0.000000e+00 : f32
    %8 = vector.broadcast %cst_5 : f32 to vector<64x64xf32>
    %9 = arith.maximumf %7, %8 : vector<64x64xf32>
    %c0_6 = arith.constant 0 : index
    %c0_7 = arith.constant 0 : index
    %10 = vector.load %arg4[%c0_6, %c0_7] : memref<64x48xf32, #tpu.memory_space<vmem>>, vector<64x48xf32>
    %11 = arith.truncf %9 : vector<64x64xf32> to vector<64x64xbf16>
    %12 = arith.truncf %10 : vector<64x48xf32> to vector<64x48xbf16>
    %cst_8 = arith.constant dense<0.000000e+00> : vector<64x48xf32>
    %13 = tpu.matmul %11, %12, %cst_8 {dimension_numbers = #tpu.dot_dimension_numbers<[1], [0], [0], [1], [0, 0, 1, 1], [], []>} : vector<64x64xbf16>, vector<64x48xbf16>, vector<64x48xf32> -> vector<64x48xf32>
    %c0_9 = arith.constant 0 : index
    %c0_10 = arith.constant 0 : index
    %14 = vector.load %arg5[%c0_9, %c0_10] : memref<1x48xf32, #tpu.memory_space<vmem>>, vector<1x48xf32>
    %15 = vector.broadcast %14 : vector<1x48xf32> to vector<64x48xf32>
    %16 = arith.addf %13, %15 : vector<64x48xf32>
    %c0_11 = arith.constant 0 : index
    %c0_12 = arith.constant 0 : index
    %17 = vector.load %arg6[%c0_11, %c0_12] : memref<64x48xf32, #tpu.memory_space<vmem>>, vector<64x48xf32>
    tpu.vector_store %arg6[%c0_11, %c0_12], %16 {strides = array<i32>} : memref<64x48xf32, #tpu.memory_space<vmem>>, vector<64x48xf32>,
    return
  }
  func.func @transform_0(%arg0: i32) -> (i32, i32) {
    %c0_i32 = arith.constant 0 : i32
    %c0_i32_0 = arith.constant 0 : i32
    return %arg0, %c0_i32 : i32, i32
  }
  func.func @transform_1(%arg0: i32) -> (i32, i32) {
    %c0_i32 = arith.constant 0 : i32
    %c0_i32_0 = arith.constant 0 : i32
    %c0_i32_1 = arith.constant 0 : i32
    return %c0_i32, %c0_i32_0 : i32, i32
  }
  func.func @transform_2(%arg0: i32) -> (i32, i32) {
    %c0_i32 = arith.constant 0 : i32
    %c0_i32_0 = arith.constant 0 : i32
    %c0_i32_1 = arith.constant 0 : i32
    return %c0_i32, %c0_i32_0 : i32, i32
  }
  func.func @transform_3(%arg0: i32) -> (i32, i32) {
    %c0_i32 = arith.constant 0 : i32
    %c0_i32_0 = arith.constant 0 : i32
    %c0_i32_1 = arith.constant 0 : i32
    return %c0_i32, %c0_i32_0 : i32, i32
  }
  func.func @transform_4(%arg0: i32) -> (i32, i32) {
    %c0_i32 = arith.constant 0 : i32
    %c0_i32_0 = arith.constant 0 : i32
    %c0_i32_1 = arith.constant 0 : i32
    return %c0_i32, %c0_i32_0 : i32, i32
  }
  func.func @transform_5(%arg0: i32) -> (i32, i32) {
    %c0_i32 = arith.constant 0 : i32
    %c0_i32_0 = arith.constant 0 : i32
    return %arg0, %c0_i32 : i32, i32
  }
}

</mosaic_0001>

<bundles_post_ra>
// kernel: tpu_custom_call.1
= control target key start
LH: loop header
LB: loop body
LE: loop exit
PB: predicated region body
PF: predicated region fallthrough
CT: control target
= control target key end

     0   :  { %vm52_vm0 = vcmask 1040384   ;;  %v186_v1 = vmov 0   ;;  %vm39_vm1 = vcmask 7168   ;;  %vm115_vm2 = vcmask 523264   ;;  %s310_s1 = inlined_call_operand.vmem [shape: f32[1,64], index: 1, kind: input, shape index: {}]   ;;  %s311_s0 = inlined_call_operand.vmem [shape: f32[64,1], index: 0, kind: input, shape index: {}]   ;;  %s312_s2 = inlined_call_operand.vmem [shape: f32[1,64], index: 2, kind: input, shape index: {}]   ;;  %s313_s4 = inlined_call_operand.vmem [shape: f32[1,48], index: 4, kind: input, shape index: {}]   ;;  %s314_s3 = inlined_call_operand.vmem [shape: f32[64,48], index: 3, kind: input, shape index: {}]   ;;  %s315_s5 = inlined_call_operand.vmem [shape: f32[64,48], index: 5, kind: output, shape index: {}]  }
   0x1   :  { %v29_v0 = vld [vmem:[%s310_s1] sm:$0x1]  ;;  %v54_v2 = vsel %vm52_vm0, 65535, %v186_v1  ;;  %v22_v5 = vld [vmem:[%s311_s0 + $0x8] sm:$0xff]  ;;  %v23_v6 = vld [vmem:[%s311_s0 + $0x10] sm:$0xff]  ;;  %vm157_vm3 = vcmask 392192  }
   0x2   :  { %v21_v3 = vld [vmem:[%s311_s0] sm:$0xff]  ;;  %v34_v4 = vpack.c.bf16 %v29_v0, %v29_v0  ;;  %v24_v7 = vld [vmem:[%s311_s0 + $0x18] sm:$0xff]  ;;  %v26_v12 = vld [vmem:[%s311_s0 + $0x28] sm:$0xff] }
   0x3   :  { %v30_v9 = vpack.c.bf16 %v22_v5, %v21_v3  ;;  %v31_v10 = vpack.c.bf16 %v24_v7, %v23_v6  ;;  %v25_v11 = vld [vmem:[%s311_s0 + $0x20] sm:$0xff]  ;;  %v27_v14 = vld [vmem:[%s311_s0 + $0x30] sm:$0xff]  ;;  %v28_v15 = vld [vmem:[%s311_s0 + $0x38] sm:$0xff] }
   0x4   :  { %v56_v8 = vand.u32 %v54_v2, %v34_v4  ;;  %v32_v13 = vpack.c.bf16 %v26_v12, %v25_v11  ;;  %v33_v16 = vpack.c.bf16 %v28_v15, %v27_v14  ;;  %v101_v17 = vld [vmem:[%s314_s3 + $0x30] sm:$0xff]  ;;  %v102_v18 = vld [vmem:[%s314_s3 + $0x38] sm:$0xff]  ;;  %v99_v20 = vld [vmem:[%s314_s3 + $0x20] sm:$0xff] }
   0x5   :  { %v110_v19 = vpack.c.bf16 %v102_v18, %v101_v17  ;;  %v100_v21 = vld [vmem:[%s314_s3 + $0x28] sm:$0xff]  ;;  %v97_v23 = vld [vmem:[%s314_s3 + $0x10] sm:$0xff]  ;;  %v98_v24 = vld [vmem:[%s314_s3 + $0x18] sm:$0xff] }
   0x6   :  { %65 = vmatpush.bf16.msra.mxu0 %v56_v8  ;;  %178 = vmatpush.bf16.msra.mxu3 %v56_v8  ;;  %v109_v22 = vpack.c.bf16 %v100_v21, %v99_v20  ;;  %v108_v25 = vpack.c.bf16 %v98_v24, %v97_v23  ;;  %v95_v26 = vld [vmem:[%s314_s3] sm:$0xff]  ;;  %v96_v27 = vld [vmem:[%s314_s3 + $0x8] sm:$0xff] }
   0x7   :  { %132 = vmatpush.bf16.msra.mxu1 %v110_v19  ;;  %179 = vmatpush.bf16.msra.mxu2 %v110_v19  ;;  %v107_v28 = vpack.c.bf16 %v96_v27, %v95_v26  ;;  %v184_v30 = vld [vmem:[%s312_s2] ss:$0 sm:$0xff] }
   0x8   :  { %v185_v58 = vld [vmem:[%s313_s4] ss:$0 sm:$0xff] }
   0x9   :  { %170 = vmatmul.msk.bf16.vlgmr.msra.gmra.mxu0 %vm39_vm1, %v30_v9  ;;  %171 = vmatmul.msk.bf16.vlgmr.msra.gmra.mxu3 %vm39_vm1, %v31_v10 }
   0xb   :  { %133 = vmatpush.bf16.msra.mxu1 %v109_v22  ;;  %180 = vmatpush.bf16.msra.mxu2 %v109_v22 }
   0xf   :  { %134 = vmatpush.bf16.msra.mxu1 %v108_v25  ;;  %181 = vmatpush.bf16.msra.mxu2 %v108_v25 }
  0x13   :  { %135 = vmatpush.bf16.msra.mxu1 %v107_v28  ;;  %182 = vmatpush.bf16.msra.mxu2 %v107_v28 }
  0x19   :  { %172 = vmatmul.msk.bf16.gmra.mxu3 %vm39_vm1, %v32_v13 }
  0x29   :  { %173 = vmatmul.msk.bf16.gmra.mxu3 %vm39_vm1, %v33_v16 }
  0x86   :  { %v67_v29 = vpop.f32.mrf.mxu0 }
  0x87   :  { %v68_v31 = vadd.f32 %v184_v30, %v67_v29 }
  0x89   :  { %v87_v34 = vmax.f32 %v68_v31, 0.0 }
  0x8c   :  { %v72_v32 = vpop.f32.mrf.mxu3 }
  0x8d   :  { %v73_v41 = vadd.f32 %v184_v30, %v72_v32 }
  0x8e   :  { %v69_v33 = vpop.f32.mrf.mxu0 }
  0x8f   :  { %v70_v35 = vadd.f32 %v184_v30, %v69_v33  ;;  %v89_v43 = vmax.f32 %v73_v41, 0.0 }
  0x91   :  { %v88_v36 = vmax.f32 %v70_v35, 0.0 }
  0x93   :  { %v103_v37 = vpack.c.bf16 %v88_v36, %v87_v34 }
  0x94   :  { %v74_v38 = vpop.f32.mrf.mxu3 }
  0x95   :  { %174 = vmatmul.msk.bf16.vlgmr.msra.gmra.mxu1 %vm115_vm2, %v103_v37  ;;  %v75_v39 = vadd.f32 %v184_v30, %v74_v38 }
  0x97   :  { %v90_v42 = vmax.f32 %v75_v39, 0.0 }
  0x99   :  { %v104_v44 = vpack.c.bf16 %v90_v42, %v89_v43 }
  0x9c   :  { %v77_v40 = vpop.f32.mrf.mxu3 }
  0x9d   :  { %v78_v45 = vadd.f32 %v184_v30, %v77_v40 }
  0x9f   :  { %v91_v48 = vmax.f32 %v78_v45, 0.0 }
  0xa4   :  { %v79_v46 = vpop.f32.mrf.mxu3 }
  0xa5   :  { %v80_v47 = vadd.f32 %v184_v30, %v79_v46  ;;  %175 = vmatmul.msk.bf16.gmra.mxu1 %vm115_vm2, %v104_v44 }
  0xa7   :  { %v92_v49 = vmax.f32 %v80_v47, 0.0 }
  0xa9   :  { %v105_v50 = vpack.c.bf16 %v92_v49, %v91_v48 }
  0xab   :  { %176 = vmatmul.msk.bf16.vlgmr.msra.gmra.mxu2 %vm115_vm2, %v105_v50 }
  0xac   :  { %v82_v51 = vpop.f32.mrf.mxu3 }
  0xad   :  { %v83_v52 = vadd.f32 %v184_v30, %v82_v51 }
  0xaf   :  { %v93_v55 = vmax.f32 %v83_v52, 0.0 }
  0xb4   :  { %v84_v53 = vpop.f32.mrf.mxu3 }
  0xb5   :  { %v85_v54 = vadd.f32 %v184_v30, %v84_v53 }
  0xb7   :  { %v94_v56 = vmax.f32 %v85_v54, 0.0 }
  0xb9   :  { %v106_v57 = vpack.c.bf16 %v94_v56, %v93_v55 }
  0xbb   :  { %177 = vmatmul.msk.bf16.gmra.mxu2 %vm115_vm2, %v106_v57 }
 0x112   :  { %v137_v59 = vpop.f32.mrf.mxu1 }
 0x113   :  { %v138_v60 = vadd.f32 %v185_v58, %v137_v59 }
 0x115   :  { %158 = vst.msk [vmem:[%s315_s5] sm:$0xff] %vm157_vm3, %v138_v60 }
 0x11a   :  { %v139_v61 = vpop.f32.mrf.mxu1 }
 0x11b   :  { %v140_v62 = vadd.f32 %v185_v58, %v139_v61 }
 0x11d   :  { %159 = vst.msk [vmem:[%s315_s5 + $0x8] sm:$0xff] %vm157_vm3, %v140_v62 }
 0x122   :  { %v142_v63 = vpop.f32.mrf.mxu1 }
 0x123   :  { %v143_v0 = vadd.f32 %v185_v58, %v142_v63 }
 0x125   :  { %160 = vst.msk [vmem:[%s315_s5 + $0x10] sm:$0xff] %vm157_vm3, %v143_v0 }
 0x12a   :  { %v144_v1 = vpop.f32.mrf.mxu1 }
 0x12b   :  { %v145_v2 = vadd.f32 %v185_v58, %v144_v1 }
 0x12d   :  { %161 = vst.msk [vmem:[%s315_s5 + $0x18] sm:$0xff] %vm157_vm3, %v145_v2 }
 0x12e   :  { %v147_v3 = vpop.f32.mrf.mxu2 }
 0x12f   :  { %v148_v4 = vadd.f32 %v185_v58, %v147_v3 }
 0x131   :  { %162 = vst.msk [vmem:[%s315_s5 + $0x20] sm:$0xff] %vm157_vm3, %v148_v4 }
 0x136   :  { %v149_v5 = vpop.f32.mrf.mxu2 }
 0x137   :  { %v150_v6 = vadd.f32 %v185_v58, %v149_v5 }
 0x139   :  { %163 = vst.msk [vmem:[%s315_s5 + $0x28] sm:$0xff] %vm157_vm3, %v150_v6 }
 0x13e   :  { %v152_v7 = vpop.f32.mrf.mxu2 }
 0x13f   :  { %v153_v8 = vadd.f32 %v185_v58, %v152_v7 }
 0x141   :  { %164 = vst.msk [vmem:[%s315_s5 + $0x30] sm:$0xff] %vm157_vm3, %v153_v8 }
 0x146   :  { %v154_v9 = vpop.f32.mrf.mxu2 }
 0x147   :  { %v155_v10 = vadd.f32 %v185_v58, %v154_v9 }
 0x149   :  { %165 = vst.msk [vmem:[%s315_s5 + $0x38] sm:$0xff] %vm157_vm3, %v155_v10 }

</bundles_post_ra>
